<compile_context>
chip_gen: v5e
topology: v5e:2x2
jax: 0.10.0
libtpu: 0.0.40
codegen_flags: <defaults>
</compile_context>

<pallas_src>
import functools

import jax
import jax.numpy as jnp
from jax.experimental import pallas as pl
from jax.experimental.pallas import tpu as pltpu


def _round_up(x, m):
    return (x + m - 1) // m * m


def _cosine_triplet_kernel(*refs, inv_temp, margin, num_neg, d_total, block_k, mask_d):
    # refs = (anc_ref, pos_ref, neg_ref_0..neg_ref_{N-1}, out_ref, acc_ref)
    anc_ref, pos_ref = refs[0], refs[1]
    neg_refs = refs[2:2 + num_neg]
    out_ref = refs[2 + num_neg]
    acc_ref = refs[3 + num_neg]                       # (tb, N+1) f32 scratch

    k = pl.program_id(1)
    nk = pl.num_programs(1)

    @pl.when(k == 0)
    def _():
        acc_ref[...] = jnp.zeros_like(acc_ref)

    # Upcast in-kernel (inputs stream in their native dtype, e.g. bf16).
    anc = anc_ref[...].astype(jnp.float32)            # (tb, tk)
    ones_col = jnp.ones((anc.shape[1], 1), dtype=jnp.float32)   # hoisted constant

    if mask_d:
        # Ragged last D block: zero out-of-range lanes so they don't pollute dots.
        lane_idx = jax.lax.broadcasted_iota(jnp.int32, anc.shape, 1)
        valid = (lane_idx + k * block_k) < d_total

    def feature_dot(x_ref):
        prod = anc * x_ref[...].astype(jnp.float32)
        if mask_d:
            prod = jnp.where(valid, prod, 0.0)
        # Row-wise feature reduction on the MXU: (tb, tk) @ (tk, 1) -> (tb, 1) f32.
        return jnp.dot(prod, ones_col, preferred_element_type=jnp.float32)

    partials = [feature_dot(pos_ref)] + [feature_dot(nr) for nr in neg_refs]
    acc_ref[...] += jnp.concatenate(partials, axis=-1)           # (tb, N+1)

    @pl.when(k == nk - 1)
    def _():
        acc = acc_ref[...]                                        # raw dot products
        a = (acc[:, 0:1] - margin) * inv_temp                     # (tb, 1)
        b = acc[:, 1:] * inv_temp                                 # (tb, N)
        m = jnp.maximum(a, jnp.max(b, axis=-1, keepdims=True))
        s = jnp.exp(a - m) + jnp.sum(jnp.exp(b - m), axis=-1, keepdims=True)
        out_ref[...] = jnp.log(s) + m - a                         # per-sample loss


def cosine_triplet_margin_loss(anc_feature, pos_feature, *neg_features,
                               temperature=0.5, margin=0.0):
    """JAX/Pallas equivalent of CosineTripletMarginLoss.forward."""
    assert len(neg_features) >= 1, "need at least one negative feature"
    B, D = anc_feature.shape
    N = len(neg_features)
    itemsize = jnp.dtype(anc_feature.dtype).itemsize
    n_streams = N + 2
    LANE, SUB = 128, 8

    # ---- generation-aware usable-VMEM budget --------------------------------
    try:
        vmem_cap = int(pltpu.get_tpu_info().vmem_capacity_bytes)
    except Exception:
        vmem_cap = 64 * 2 ** 20                 # conservative (v7x-sized) fallback
    if vmem_cap <= 64 * 2 ** 20:                # v7x: 64 MiB physical per TC
        budget = 40 * 2 ** 20
    else:                                       # v5e / v6e: 128 MiB physical
        budget = 56 * 2 ** 20

    # ---- feature (D) tile: only tile D if even an 8-row block can't fit -----
    tk = D
    if 2 * n_streams * SUB * D * itemsize > budget:
        tk = max(LANE, (budget // (2 * n_streams * SUB * itemsize)) // LANE * LANE)
    nk = pl.cdiv(D, tk)
    mask_d = (D % tk) != 0

    # ---- batch (B) tile: biggest multiple of 8 rows that fits the budget ----
    # 2x double-buffered inputs + (tb, N+1) f32 scratch + double-buffered (tb,1) out
    per_row_bytes = 2 * n_streams * tk * itemsize + 3 * LANE * 4
    tb = max(SUB, (budget // per_row_bytes) // SUB * SUB)
    tb = min(tb, _round_up(B, SUB))
    if B >= 2 * SUB and tb >= B:
        # Keep >= 2 batch tiles so the "parallel" axis can shard across TCs (v7x).
        tb = max(SUB, _round_up(pl.cdiv(B, 2), SUB))
    if B < SUB:
        tb = B                                  # full-dim block (allowed)
    nb = pl.cdiv(B, tb)

    footprint = 2 * n_streams * tb * tk * itemsize + 3 * tb * LANE * 4
    vmem_limit = int(max(footprint + 8 * 2 ** 20, 16 * 2 ** 20))

    kernel = functools.partial(
        _cosine_triplet_kernel,
        inv_temp=1.0 / float(temperature),
        margin=float(margin),
        num_neg=N,
        d_total=D,
        block_k=tk,
        mask_d=mask_d,
    )

    feat_spec = pl.BlockSpec((tb, tk), lambda i, k: (i, k))
    cost = pl.CostEstimate(
        flops=2 * (N + 1) * B * D,
        transcendentals=(N + 2) * B,
        bytes_accessed=n_streams * B * D * itemsize + B * 4,
    )

    per_sample = pl.pallas_call(
        kernel,
        out_shape=jax.ShapeDtypeStruct((B, 1), jnp.float32),
        grid=(nb, nk),
        in_specs=[feat_spec] * n_streams,
        out_specs=pl.BlockSpec((tb, 1), lambda i, k: (i, 0)),
        scratch_shapes=[pltpu.VMEM((tb, N + 1), jnp.float32)],
        compiler_params=pltpu.CompilerParams(
            dimension_semantics=("parallel", "arbitrary"),
            vmem_limit_bytes=vmem_limit,
        ),
        cost_estimate=cost,
    )(anc_feature, pos_feature, *neg_features)

    # Final batch mean in the wrapper -> batch grid axis stays "parallel".
    return jnp.mean(per_sample[:, 0])


def _reference(anc, pos, negs_list, temperature=0.5, margin=0.0):
    pos_v = jnp.exp((jnp.sum(anc * pos, axis=1) - margin) / temperature)
    neg_v = jnp.zeros_like(pos_v)
    for n in negs_list:
        neg_v = neg_v + jnp.exp(jnp.sum(anc * n, axis=1) / temperature)
    return jnp.mean(jnp.log(1.0 + neg_v / pos_v))


if __name__ == "__main__":
    key = jax.random.PRNGKey(0)
    k_anc, k_pos, k_n0, k_n1, k_n2 = jax.random.split(key, 5)

    B, D = 8, 32

    def _norm(x):
        return x / jnp.linalg.norm(x, axis=1, keepdims=True)

    anc = _norm(jax.random.normal(k_anc, (B, D), dtype=jnp.float32))
    pos = _norm(jax.random.normal(k_pos, (B, D), dtype=jnp.float32))
    negs = [_norm(jax.random.normal(k, (B, D), dtype=jnp.float32))
            for k in (k_n0, k_n1, k_n2)]

    loss = cosine_triplet_margin_loss(anc, pos, *negs, temperature=0.5, margin=0.0)
    loss = jax.block_until_ready(loss)

    ref = _reference(anc, pos, negs, temperature=0.5, margin=0.0)
    assert jnp.allclose(loss, ref, rtol=1e-5, atol=1e-5), (loss, ref)

    print("KERNEL_OK")
</pallas_src>

<mosaic_0001>
module attributes {stable_mosaic.version = 11 : i64} {
  func.func @_cosine_triplet_kernel(%arg0: i32, %arg1: i32, %arg2: memref<8x32xf32, #tpu.memory_space<vmem>>, %arg3: memref<8x32xf32, #tpu.memory_space<vmem>>, %arg4: memref<8x32xf32, #tpu.memory_space<vmem>>, %arg5: memref<8x32xf32, #tpu.memory_space<vmem>>, %arg6: memref<8x32xf32, #tpu.memory_space<vmem>>, %arg7: memref<8x1xf32, #tpu.memory_space<vmem>>, %arg8: memref<8x4xf32, #tpu.memory_space<vmem>>) attributes {dimension_semantics = [#tpu.dimension_semantics<parallel>, #tpu.dimension_semantics<arbitrary>], iteration_bounds = array<i64: 1, 1>, scalar_prefetch = 0 : i64, scratch_operands = 1 : i64, tpu.core_type = #tpu.core_type<tc>, window_params = [{transform_indices = @transform_0, window_bounds = array<i64: 8, 32>}, {transform_indices = @transform_1, window_bounds = array<i64: 8, 32>}, {transform_indices = @transform_2, window_bounds = array<i64: 8, 32>}, {transform_indices = @transform_3, window_bounds = array<i64: 8, 32>}, {transform_indices = @transform_4, window_bounds = array<i64: 8, 32>}, {transform_indices = @transform_5, window_bounds = array<i64: 8, 1>}]} {
    %c0_i32 = arith.constant 0 : i32
    %0 = arith.cmpi eq, %arg1, %c0_i32 : i32
    %1 = arith.extui %0 : i1 to i32
    %c0_i32_0 = arith.constant 0 : i32
    %2 = arith.cmpi ne, %1, %c0_i32_0 : i32
    scf.if %2 {
      %cst_20 = arith.constant 0.000000e+00 : f32
      %24 = vector.broadcast %cst_20 : f32 to vector<8x4xf32>
      %c0_21 = arith.constant 0 : index
      %c0_22 = arith.constant 0 : index
      %25 = vector.load %arg8[%c0_21, %c0_22] : memref<8x4xf32, #tpu.memory_space<vmem>>, vector<8x4xf32>
      tpu.vector_store %arg8[%c0_21, %c0_22], %24 {strides = array<i32>} : memref<8x4xf32, #tpu.memory_space<vmem>>, vector<8x4xf32>,
    } else {
    }
    %c0 = arith.constant 0 : index
    %c0_1 = arith.constant 0 : index
    %3 = vector.load %arg2[%c0, %c0_1] : memref<8x32xf32, #tpu.memory_space<vmem>>, vector<8x32xf32>
    %cst = arith.constant 1.000000e+00 : f32
    %4 = vector.broadcast %cst : f32 to vector<32x1xf32>
    %c0_2 = arith.constant 0 : index
    %c0_3 = arith.constant 0 : index
    %5 = vector.load %arg3[%c0_2, %c0_3] : memref<8x32xf32, #tpu.memory_space<vmem>>, vector<8x32xf32>
    %6 = arith.mulf %3, %5 : vector<8x32xf32>
    %cst_4 = arith.constant dense<0.000000e+00> : vector<8x1xf32>
    %7 = tpu.matmul %6, %4, %cst_4 {dimension_numbers = #tpu.dot_dimension_numbers<[1], [0], [0], [1], [0, 0, 1, 1], [], []>} : vector<8x32xf32>, vector<32x1xf32>, vector<8x1xf32> -> vector<8x1xf32>
    %c0_5 = arith.constant 0 : index
    %c0_6 = arith.constant 0 : index
    %8 = vector.load %arg4[%c0_5, %c0_6] : memref<8x32xf32, #tpu.memory_space<vmem>>, vector<8x32xf32>
    %9 = arith.mulf %3, %8 : vector<8x32xf32>
    %cst_7 = arith.constant dense<0.000000e+00> : vector<8x1xf32>
    %10 = tpu.matmul %9, %4, %cst_7 {dimension_numbers = #tpu.dot_dimension_numbers<[1], [0], [0], [1], [0, 0, 1, 1], [], []>} : vector<8x32xf32>, vector<32x1xf32>, vector<8x1xf32> -> vector<8x1xf32>
    %c0_8 = arith.constant 0 : index
    %c0_9 = arith.constant 0 : index
    %11 = vector.load %arg5[%c0_8, %c0_9] : memref<8x32xf32, #tpu.memory_space<vmem>>, vector<8x32xf32>
    %12 = arith.mulf %3, %11 : vector<8x32xf32>
    %cst_10 = arith.constant dense<0.000000e+00> : vector<8x1xf32>
    %13 = tpu.matmul %12, %4, %cst_10 {dimension_numbers = #tpu.dot_dimension_numbers<[1], [0], [0], [1], [0, 0, 1, 1], [], []>} : vector<8x32xf32>, vector<32x1xf32>, vector<8x1xf32> -> vector<8x1xf32>
    %c0_11 = arith.constant 0 : index
    %c0_12 = arith.constant 0 : index
    %14 = vector.load %arg6[%c0_11, %c0_12] : memref<8x32xf32, #tpu.memory_space<vmem>>, vector<8x32xf32>
    %15 = arith.mulf %3, %14 : vector<8x32xf32>
    %cst_13 = arith.constant dense<0.000000e+00> : vector<8x1xf32>
    %16 = tpu.matmul %15, %4, %cst_13 {dimension_numbers = #tpu.dot_dimension_numbers<[1], [0], [0], [1], [0, 0, 1, 1], [], []>} : vector<8x32xf32>, vector<32x1xf32>, vector<8x1xf32> -> vector<8x1xf32>
    %c0_14 = arith.constant 0 : index
    %c0_15 = arith.constant 0 : index
    %17 = vector.load %arg8[%c0_14, %c0_15] : memref<8x4xf32, #tpu.memory_space<vmem>>, vector<8x4xf32>
    %18 = tpu.concatenate %7, %10, %13, %16 in 1 : vector<8x1xf32>, vector<8x1xf32>, vector<8x1xf32>, vector<8x1xf32> -> vector<8x4xf32>
    %19 = arith.addf %17, %18 : vector<8x4xf32>
    %c0_16 = arith.constant 0 : index
    %c0_17 = arith.constant 0 : index
    %20 = vector.load %arg8[%c0_16, %c0_17] : memref<8x4xf32, #tpu.memory_space<vmem>>, vector<8x4xf32>
    tpu.vector_store %arg8[%c0_16, %c0_17], %19 {strides = array<i32>} : memref<8x4xf32, #tpu.memory_space<vmem>>, vector<8x4xf32>,
    %c0_i32_18 = arith.constant 0 : i32
    %21 = arith.cmpi eq, %arg1, %c0_i32_18 : i32
    %22 = arith.extui %21 : i1 to i32
    %c0_i32_19 = arith.constant 0 : i32
    %23 = arith.cmpi ne, %22, %c0_i32_19 : i32
    scf.if %23 {
      %c0_20 = arith.constant 0 : index
      %c0_21 = arith.constant 0 : index
      %24 = vector.load %arg8[%c0_20, %c0_21] : memref<8x4xf32, #tpu.memory_space<vmem>>, vector<8x4xf32>
      %25 = vector.extract_strided_slice %24 {offsets = [0, 0], sizes = [8, 1], strides = [1, 1]} : vector<8x4xf32> to vector<8x1xf32>
      %cst_22 = arith.constant 0.000000e+00 : f32
      %26 = vector.broadcast %cst_22 : f32 to vector<8x1xf32>
      %27 = arith.subf %25, %26 : vector<8x1xf32>
      %cst_23 = arith.constant 2.000000e+00 : f32
      %28 = vector.broadcast %cst_23 : f32 to vector<8x1xf32>
      %29 = arith.mulf %27, %28 : vector<8x1xf32>
      %30 = vector.extract_strided_slice %24 {offsets = [0, 1], sizes = [8, 3], strides = [1, 1]} : vector<8x4xf32> to vector<8x3xf32>
      %cst_24 = arith.constant 2.000000e+00 : f32
      %31 = vector.broadcast %cst_24 : f32 to vector<8x3xf32>
      %32 = arith.mulf %30, %31 : vector<8x3xf32>
      %cst_25 = arith.constant dense<0xFF800000> : vector<8xf32>
      %33 = vector.multi_reduction <maximumf>, %32, %cst_25 [1] : vector<8x3xf32> to vector<8xf32>
      %34 = vector.shape_cast %33 : vector<8xf32> to vector<8x1xf32>
      %35 = arith.maximumf %29, %34 : vector<8x1xf32>
      %36 = arith.subf %29, %35 : vector<8x1xf32>
      %37 = math.exp %36 : vector<8x1xf32>
      %38 = vector.broadcast %35 : vector<8x1xf32> to vector<8x3xf32>
      %39 = arith.subf %32, %38 : vector<8x3xf32>
      %40 = math.exp %39 : vector<8x3xf32>
      %cst_26 = arith.constant dense<0.000000e+00> : vector<8xf32>
      %41 = vector.multi_reduction <add>, %40, %cst_26 [1] : vector<8x3xf32> to vector<8xf32>
      %42 = vector.shape_cast %41 : vector<8xf32> to vector<8x1xf32>
      %43 = arith.addf %37, %42 : vector<8x1xf32>
      %44 = math.log %43 : vector<8x1xf32>
      %45 = arith.addf %44, %35 : vector<8x1xf32>
      %46 = arith.subf %45, %29 : vector<8x1xf32>
      %c0_27 = arith.constant 0 : index
      %c0_28 = arith.constant 0 : index
      %47 = vector.load %arg7[%c0_27, %c0_28] : memref<8x1xf32, #tpu.memory_space<vmem>>, vector<8x1xf32>
      tpu.vector_store %arg7[%c0_27, %c0_28], %46 {strides = array<i32>} : memref<8x1xf32, #tpu.memory_space<vmem>>, vector<8x1xf32>,
    } else {
    }
    return
  }
  func.func @transform_0(%arg0: i32, %arg1: i32) -> (i32, i32) {
    %c0_i32 = arith.constant 0 : i32
    return %arg0, %arg1 : i32, i32
  }
  func.func @transform_1(%arg0: i32, %arg1: i32) -> (i32, i32) {
    %c0_i32 = arith.constant 0 : i32
    return %arg0, %arg1 : i32, i32
  }
  func.func @transform_2(%arg0: i32, %arg1: i32) -> (i32, i32) {
    %c0_i32 = arith.constant 0 : i32
    return %arg0, %arg1 : i32, i32
  }
  func.func @transform_3(%arg0: i32, %arg1: i32) -> (i32, i32) {
    %c0_i32 = arith.constant 0 : i32
    return %arg0, %arg1 : i32, i32
  }
  func.func @transform_4(%arg0: i32, %arg1: i32) -> (i32, i32) {
    %c0_i32 = arith.constant 0 : i32
    return %arg0, %arg1 : i32, i32
  }
  func.func @transform_5(%arg0: i32, %arg1: i32) -> (i32, i32) {
    %c0_i32 = arith.constant 0 : i32
    %c0_i32_0 = arith.constant 0 : i32
    return %arg0, %c0_i32 : i32, i32
  }
}

</mosaic_0001>

<bundles_post_ra>
// kernel: tpu_custom_call.1
= control target key start
LH: loop header
LB: loop body
LE: loop exit
PB: predicated region body
PF: predicated region fallthrough
CT: control target
= control target key end

     0   :  { %10 = vsyncpa [#allocation4], 0  ;;  %s473_s0 = inlined_call_operand.hbm [shape: f32[8,32], index: 0, kind: input, shape index: {}]   ;;  %s474_s1 = inlined_call_operand.hbm [shape: f32[8,32], index: 1, kind: input, shape index: {}]   ;;  %s475_s2 = inlined_call_operand.hbm [shape: f32[8,32], index: 2, kind: input, shape index: {}]   ;;  %s476_s3 = inlined_call_operand.hbm [shape: f32[8,32], index: 3, kind: input, shape index: {}]   ;;  %s477_s4 = inlined_call_operand.hbm [shape: f32[8,32], index: 4, kind: input, shape index: {}]   ;;  %s478_s5 = inlined_call_operand.vmem [shape: f32[8,1], index: 5, kind: output, shape index: {}]  }
   0x1   :  { %11 = vsyncpa [#allocation6], 0  ;;  %s29_s20 = sshll.u32 %s474_s1, 4  ;;  %s30_s20 = int_to_ptr.hbm [resolvable:$true] %s29_s20 }
   0x2   :  { %12 = vsyncpa [#allocation9], 0  ;;  %s409_s21 = smov [#allocation5]   ;;  %s51_s25 = sshll.u32 %s476_s3, 4  ;;  %s52_s25 = int_to_ptr.hbm [resolvable:$true] %s51_s25 }
   0x3   :  { %s31_s22 = sshll.u32 %s409_s21, 4  ;;  %s410_s26 = smov [#allocation8]   ;;  %s32_s22 = int_to_ptr.vmem [resolvable:$true] %s31_s22 }
   0x4   :  { %34 = dma.hbm_to_vmem [thread:$0]  %s30_s20, 128, %s32_s22, [#allocation6]  }
   0x5   :  { %s53_s27 = sshll.u32 %s410_s26, 4  ;;  %s18_s30 = sshll.u32 %s473_s0, 4  ;;  %s54_s27 = int_to_ptr.vmem [resolvable:$true] %s53_s27  ;;  %s19_s30 = int_to_ptr.hbm [resolvable:$true] %s18_s30 }
   0x6   :  { %56 = dma.hbm_to_vmem [thread:$0]  %s52_s25, 128, %s54_s27, [#allocation9]  }
   0x7   :  { %s40_s7 = sshll.u32 %s475_s2, 4  ;;  %s411_s8 = smov [#allocation3]   ;;  %s41_s7 = int_to_ptr.hbm [resolvable:$true] %s40_s7 }
   0x8   :  { %s20_s9 = sshll.u32 %s411_s8, 4  ;;  %s412_s3 = smov [#allocation7]   ;;  %s21_s9 = int_to_ptr.vmem [resolvable:$true] %s20_s9 }
   0x9   :  { %23 = dma.hbm_to_vmem [thread:$0]  %s19_s30, 128, %s21_s9, [#allocation4]  }
   0xa   :  { %s42_s10 = sshll.u32 %s412_s3, 4  ;;  %s62_s13 = sshll.u32 %s477_s4, 4  ;;  %s43_s10 = int_to_ptr.vmem [resolvable:$true] %s42_s10  ;;  %s63_s13 = int_to_ptr.hbm [resolvable:$true] %s62_s13 }
   0xb   :  { %45 = dma.hbm_to_vmem [thread:$0]  %s41_s7, 128, %s43_s10, [#allocation6]  }
   0xc   :  { %s413_s0 = smov [#allocation10]  }
   0xd   :  { %s64_s14 = sshll.u32 %s413_s0, 4  ;;  %s65_s14 = int_to_ptr.vmem [resolvable:$true] %s64_s14 }
   0xe   :  { %67 = dma.hbm_to_vmem [thread:$0]  %s63_s13, 128, %s65_s14, [#allocation9]  }
   0xf   :  { %403 = dma.done.wait [#allocation4], 128  }
  0x10   :  { %404 = vsyncadd [#allocation4], 4294967168 }
  0x11   :  { %405 = dma.done.wait [#allocation6], 256  }
  0x12   :  { %406 = vsyncadd [#allocation6], 4294967040 }
  0x13   :  { %407 = dma.done.wait [#allocation9], 256  }
  0x14   :  { %408 = vsyncadd [#allocation9], 4294967040  ;;  %v414_v0 = vmov 1.0   ;;  %v94_v1 = vld [vmem:[#allocation3] sm:$0xff]  ;;  %vm97_vm0 = vcmask 261120   ;;  %v121_v2 = vld [vmem:[#allocation7] sm:$0xff] }
  0x15   :  { %138 = vmatpush.msra.mxu1 %v414_v0  ;;  %163 = vmatpush.msra.mxu2 %v414_v0  ;;  %v146_v3 = vld [vmem:[#allocation8] sm:$0xff]  ;;  %v122_v4 = vmul.f32 %v121_v2, %v94_v1  ;;  %v171_v6 = vld [vmem:[#allocation10] sm:$0xff]  ;;  %v95_v7 = vld [vmem:[#allocation5] sm:$0xff]  ;;  %s415_s2 = smov 1   ;;  %s416_s4 = smov 3   ;;  %vm92_vm1 = vcmask 31744  }
  0x16   :  { %188 = vmatpush.msra.mxu3 %v414_v0  ;;  %113 = vmatpush.msra.mxu0 %v414_v0  ;;  %v147_v5 = vmul.f32 %v146_v3, %v94_v1  ;;  %v172_v8 = vmul.f32 %v171_v6, %v94_v1  ;;  %v96_v9 = vmul.f32 %v95_v7, %v94_v1  ;;  %s417_s15 = smov 2   ;;  %v418_v13 = vmov 0.0   ;;  %s420_s16 = smov 127  }
  0x17   :  { %139 = vmatpush.msra.mxu1 %v414_v0  ;;  %164 = vmatpush.msra.mxu2 %v414_v0  ;;  %93 = vst.msk [vmem:[#allocation2] sm:$0xff] %vm92_vm1, %v418_v13  ;;  %vm209_vm2 = vcmask 7168   ;;  %vm211_vm3 = vcmask 15360   ;;  %vm213_vm4 = vcmask 23552   ;;  %vm223_vm5 = vcmask 31752  }
  0x18   :  { %189 = vmatpush.msra.mxu3 %v414_v0  ;;  %114 = vmatpush.msra.mxu0 %v414_v0  ;;  %v419_v26 = vmov 0  }
  0x19   :  { %140 = vmatpush.msra.mxu1 %v414_v0  ;;  %165 = vmatpush.msra.mxu2 %v414_v0 }
  0x1a   :  { %190 = vmatpush.msra.mxu3 %v414_v0  ;;  %115 = vmatpush.msra.mxu0 %v414_v0 }
  0x1b   :  { %141 = vmatpush.msra.mxu1 %v414_v0  ;;  %166 = vmatpush.msra.mxu2 %v414_v0 }
  0x1c   :  { %191 = vmatpush.msra.mxu3 %v414_v0  ;;  %116 = vmatpush.msra.mxu0 %v414_v0 }
  0x1d   :  { %260 = vmatmul.msk.f32.vlgmr.msra.gmra.mxu1 %vm97_vm0, %v122_v4  ;;  %261 = vmatmul.msk.f32.vlgmr.msra.gmra.mxu2 %vm97_vm0, %v147_v5 }
  0x1e   :  { %262 = vmatmul.msk.f32.vlgmr.msra.gmra.mxu3 %vm97_vm0, %v172_v8  ;;  %259 = vmatmul.msk.f32.vlgmr.msra.gmra.mxu0 %vm97_vm0, %v96_v9  ;;  %v196_v19 = vld [vmem:[#allocation2] sm:$0xff] }
  0x1f   :  { %275 = vset.pattern.permute.xlu2 %v419_v26  ;;  %276 = vset.pattern.permute.xlu0 %v419_v26 }
  0x9a   :  { %v143_v10 = vpop.f32.mrf.mxu1 }
  0x9b   :  { %198 = vrot.lane.b32.xlu0 %v143_v10, %s415_s2  ;;  %v118_v15 = vpop.f32.mrf.mxu0 }
  0xa0   :  { %v168_v11 = vpop.f32.mrf.mxu2 }
  0xa1   :  { %v193_v12 = vpop.f32.mrf.mxu3 }
  0xa2   :  { %206 = vrot.lane.b32.xlu1 %v193_v12, %s416_s4 }
  0xa3   :  { %202 = vrot.lane.b32.xlu0 %v168_v11, %s417_s15 }
 0x10d   :  { %v199_v14 = vpop.permute.xlu0 %198 }
 0x10e   :  { %v210_v17 = vsel %vm209_vm2, %v118_v15, %v199_v14 }
 0x114   :  { %v207_v16 = vpop.permute.xlu1 %206 }
 0x115   :  { %v203_v18 = vpop.permute.xlu0 %202 }
 0x116   :  { %v212_v20 = vsel %vm211_vm3, %v210_v17, %v203_v18 }
 0x117   :  { %v214_v21 = vsel %vm213_vm4, %v212_v20, %v207_v16 }
 0x118   :  { %v215_v22 = vadd.f32 %v214_v21, %v196_v19 }
 0x11a   :  { %217 = vst.msk [vmem:[#allocation2] sm:$0xff] %vm92_vm1, %v215_v22 }
 0x121   :  { %v221_v23 = vld [vmem:[#allocation2] sm:$0xff] }
 0x122   :  { %v222_v24 = vmul.f32 2.0, %v221_v23 }
 0x124   :  { %v224_v25 = vsel %vm223_vm5, %v222_v24, -inf }
 0x125   :  { %225 = vmax.xlane.f32.xlu1 %v224_v25 }
 0x198   :  { %v226_v27 = vpop.xlane.xlu1 %225 }
 0x199   :  { %v227_v28 = vmax.f32 %v222_v24, %v226_v27 }
 0x19b   :  { %233 = vperm.xlu2 %275, %v227_v28   ;;  %v228_v35 = vsub.f32 %v222_v24, %v227_v28 }
 0x19d   :  { %v229_v36 = vmul.f32 1.442695, %v228_v35 }
 0x1f5   :  { %v234_v29 = vpop.permute.xlu2 %233 }
 0x1f6   :  { %v236_v30 = vsub.f32 %v222_v24, %v234_v29 }
 0x1f8   :  { %v237_v31 = vmul.f32 1.442695, %v236_v30 }
 0x1fa   :  { %277 = vpow2.f32 %v237_v31 }
 0x1fb   :  { %279 = vpow2.f32 %v229_v36 }
 0x200   :  { %v278_v32 = vpop.eup %277 }
 0x201   :  { %240 = vrot.lane.b32.xlu2 %v278_v32, %s420_s16  ;;  %v280_v37 = vpop.eup %279 }
 0x25b   :  { %v241_v33 = vpop.permute.xlu2 %240 }
 0x25c   :  { %v243_v34 = vsel %vm213_vm4, %v241_v33, 0.0 }
 0x25d   :  { %244 = vadd.xlane.f32.xlu0 %v243_v34 }
 0x2d0   :  { %v245_v38 = vpop.xlane.xlu0 %244 }
 0x2d1   :  { %v246_v39 = vadd.f32 %v280_v37, %v245_v38 }
 0x2d3   :  { %281 = vlog2.f32 %v246_v39 }
 0x2d9   :  { %v282_v40 = vpop.eup %281 }
 0x2da   :  { %v248_v41 = vmul.f32 0.6931472, %v282_v40 }
 0x2dc   :  { %v249_v42 = vadd.f32 %v248_v41, %v227_v28 }
 0x2de   :  { %v250_v43 = vsub.f32 %v249_v42, %v222_v24 }
 0x2e0   :  { %251 = vst.msk [vmem:[%s478_s5] sm:$0xff] %vm209_vm2, %v250_v43 }
 0x2e1   :  { %256 = vsyncpa [#allocation4], 1 }
 0x2e2   :  { %257 = vsyncpa [#allocation6], 1 }
 0x2e3   :  { %258 = vsyncpa [#allocation9], 1 }

</bundles_post_ra>
